<compile_context>
chip_gen: v7x
topology: tpu7x:2x2x1
jax: 0.10.0
libtpu: 0.0.40
codegen_flags: <defaults>
</compile_context>

<pallas_src>
import jax
import jax.numpy as jnp
from jax.experimental import pallas as pl
from jax.experimental.pallas import tpu as pltpu

_EPS = 1e-5


def _dasi_fused_kernel(x_ref, ws_ref, bs_ref, wt_ref, bt_ref,
                       scale_ref, shift_ref, o_ref):
    """Fused DASI forward on one (1, C_in, THW) spatial tile.

    out = relu( bns( tail(skip(x)) + skip(x) ) ), all BatchNorms folded.
    """
    x = x_ref[0].astype(jnp.float32)                       # (C_in, THW)
    ws = ws_ref[...].astype(jnp.float32)                   # (C_out, C_in)  BN-folded
    wt = wt_ref[...].astype(jnp.float32)                   # (C_out, C_out) BN-folded

    # skips branch: 1x1 conv + folded BN
    s = jnp.dot(ws, x, preferred_element_type=jnp.float32) + bs_ref[...]
    # tail_conv branch applied on the skips output: 1x1 conv + folded BN
    t = jnp.dot(wt, s, preferred_element_type=jnp.float32) + bt_ref[...]
    # residual add + final BN (folded to per-channel affine) + ReLU
    y = (t + s) * scale_ref[...] + shift_ref[...]
    o_ref[0] = jnp.maximum(y, 0.0).astype(o_ref.dtype)


def _fold_conv_bn(w, b, gamma, beta, mean, var, eps=_EPS):
    """Fold Conv1x1 + eval-mode BatchNorm into an affine (W', b')."""
    inv = gamma * jax.lax.rsqrt(var + eps)                  # (C_out,)
    w_f = w * inv[:, None]                                  # (C_out, C_in)
    b_f = (b - mean) * inv + beta                           # (C_out,)
    return w_f, b_f


def _pick_tile_hw(hw, c_in, c_out, itemsize):
    """Largest 128-multiple spatial tile fitting a ~12 MiB VMEM budget
    (double-buffered in/out pipeline tiles + f32 intermediates s, t, y)."""
    if hw <= 128:
        return hw
    budget = 12 << 20
    per_col = 2 * (c_in + c_out) * itemsize + 3 * c_out * 4
    t = max(128, (budget // per_col) // 128 * 128)
    return hw if t >= hw else t


def dasi_forward(x, params, *, tile_hw=None):
    """Inference forward of DASI: relu(bns(tail_conv(skips(x)) + skips(x))).

    x: (N, C_in, H, W) NCHW (PyTorch layout).
    params: dict of conv weights/biases and BatchNorm (gamma, beta, mean, var).
    """
    n, c_in, h, w = x.shape
    c_out = params["skips_w"].shape[0]
    hw = h * w

    # Fold every eval-mode BatchNorm (tiny parameter-only math, done once).
    ws, bs = _fold_conv_bn(params["skips_w"], params["skips_b"], *params["skips_bn"])
    wt, bt = _fold_conv_bn(params["tail_w"], params["tail_b"], *params["tail_bn"])
    g, bb, m, v = params["bns_bn"]
    bns_scale = g * jax.lax.rsqrt(v + _EPS)
    bns_shift = bb - m * bns_scale

    x3 = x.reshape(n, c_in, hw)                             # view, no HBM copy

    if tile_hw is None:
        tile_hw = _pick_tile_hw(hw, c_in, c_out, x.dtype.itemsize)
    grid = (n, pl.cdiv(hw, tile_hw))                        # ragged last tile is OK

    out = pl.pallas_call(
        _dasi_fused_kernel,
        out_shape=jax.ShapeDtypeStruct((n, c_out, hw), x.dtype),
        grid_spec=pltpu.PrefetchScalarGridSpec(
            num_scalar_prefetch=0,
            grid=grid,
            in_specs=[
                pl.BlockSpec((1, c_in, tile_hw), lambda i, j: (i, 0, j)),
                pl.BlockSpec((c_out, c_in), lambda i, j: (0, 0)),
                pl.BlockSpec((c_out, 1), lambda i, j: (0, 0)),
                pl.BlockSpec((c_out, c_out), lambda i, j: (0, 0)),
                pl.BlockSpec((c_out, 1), lambda i, j: (0, 0)),
                pl.BlockSpec((c_out, 1), lambda i, j: (0, 0)),
                pl.BlockSpec((c_out, 1), lambda i, j: (0, 0)),
            ],
            out_specs=pl.BlockSpec((1, c_out, tile_hw), lambda i, j: (i, 0, j)),
        ),
        compiler_params=pltpu.CompilerParams(
            dimension_semantics=("parallel", "parallel"),
            vmem_limit_bytes=32 * 1024 * 1024,
        ),
    )(
        x3,
        ws.astype(jnp.float32),
        bs[:, None].astype(jnp.float32),
        wt.astype(jnp.float32),
        bt[:, None].astype(jnp.float32),
        bns_scale[:, None].astype(jnp.float32),
        bns_shift[:, None].astype(jnp.float32),
    )
    return out.reshape(n, c_out, h, w)


if __name__ == "__main__":
    key = jax.random.PRNGKey(0)
    n, c_in, c_out, h, w = 2, 32, 64, 16, 16
    k0, k1, k2, k3, k4 = jax.random.split(key, 5)

    x = jax.random.normal(k0, (n, c_in, h, w), dtype=jnp.float32)

    # Conv 1x1 params (kaiming-uniform-ish); BatchNorms at PyTorch init
    # (gamma=1, beta=0, running_mean=0, running_var=1), evaluated in eval mode.
    lim_s = 1.0 / (c_in ** 0.5)
    lim_t = 1.0 / (c_out ** 0.5)
    ones = jnp.ones((c_out,), jnp.float32)
    zeros = jnp.zeros((c_out,), jnp.float32)
    params = {
        "skips_w": jax.random.uniform(k1, (c_out, c_in), jnp.float32, -lim_s, lim_s),
        "skips_b": jax.random.uniform(k2, (c_out,), jnp.float32, -lim_s, lim_s),
        "skips_bn": (ones, zeros, zeros, ones),
        "tail_w": jax.random.uniform(k3, (c_out, c_out), jnp.float32, -lim_t, lim_t),
        "tail_b": jax.random.uniform(k4, (c_out,), jnp.float32, -lim_t, lim_t),
        "tail_bn": (ones, zeros, zeros, ones),
        "bns_bn": (ones, zeros, zeros, ones),
    }

    y = jax.block_until_ready(dasi_forward(x, params))

    # ---- pure-JAX reference (unfused, NCHW, eval-mode BN) ----
    def bn(v, p):
        g, b, m, va = p
        inv = jax.lax.rsqrt(va + _EPS)
        return (v - m[None, :, None, None]) * (g * inv)[None, :, None, None] \
            + b[None, :, None, None]

    def conv1x1(v, wgt, bia):
        return jnp.einsum("nchw,oc->nohw", v, wgt) + bia[None, :, None, None]

    s_ref = bn(conv1x1(x, params["skips_w"], params["skips_b"]), params["skips_bn"])
    t_ref = bn(conv1x1(s_ref, params["tail_w"], params["tail_b"]), params["tail_bn"])
    y_ref = jnp.maximum(bn(t_ref + s_ref, params["bns_bn"]), 0.0)

    assert y.shape == y_ref.shape, (y.shape, y_ref.shape)
    max_err = jnp.max(jnp.abs(y - y_ref))
    assert jnp.allclose(y, y_ref, atol=2e-2, rtol=2e-2), f"max abs err {max_err}"
    print("KERNEL_OK")
</pallas_src>

<mosaic_0001>
module attributes {stable_mosaic.version = 11 : i64} {
  func.func @_dasi_fused_kernel(%arg0: i32, %arg1: i32, %arg2: memref<1x32x256xf32, #tpu.memory_space<vmem>>, %arg3: memref<64x32xf32, #tpu.memory_space<vmem>>, %arg4: memref<64x1xf32, #tpu.memory_space<vmem>>, %arg5: memref<64x64xf32, #tpu.memory_space<vmem>>, %arg6: memref<64x1xf32, #tpu.memory_space<vmem>>, %arg7: memref<64x1xf32, #tpu.memory_space<vmem>>, %arg8: memref<64x1xf32, #tpu.memory_space<vmem>>, %arg9: memref<1x64x256xf32, #tpu.memory_space<vmem>>) attributes {dimension_semantics = [#tpu.dimension_semantics<parallel>, #tpu.dimension_semantics<parallel>], iteration_bounds = array<i64: 2, 1>, scalar_prefetch = 0 : i64, scratch_operands = 0 : i64, tpu.core_type = #tpu.core_type<tc>, window_params = [{transform_indices = @transform_0, window_bounds = array<i64: 1, 32, 256>}, {pipeline_mode = #tpu.pipeline_mode<synchronous>, transform_indices = @transform_1, window_bounds = array<i64: 64, 32>}, {pipeline_mode = #tpu.pipeline_mode<synchronous>, transform_indices = @transform_2, window_bounds = array<i64: 64, 1>}, {pipeline_mode = #tpu.pipeline_mode<synchronous>, transform_indices = @transform_3, window_bounds = array<i64: 64, 64>}, {pipeline_mode = #tpu.pipeline_mode<synchronous>, transform_indices = @transform_4, window_bounds = array<i64: 64, 1>}, {pipeline_mode = #tpu.pipeline_mode<synchronous>, transform_indices = @transform_5, window_bounds = array<i64: 64, 1>}, {pipeline_mode = #tpu.pipeline_mode<synchronous>, transform_indices = @transform_6, window_bounds = array<i64: 64, 1>}, {transform_indices = @transform_7, window_bounds = array<i64: 1, 64, 256>}]} {
    %c0 = arith.constant 0 : index
    %c0_0 = arith.constant 0 : index
    %c0_1 = arith.constant 0 : index
    %0 = vector.load %arg2[%c0, %c0_0, %c0_1] : memref<1x32x256xf32, #tpu.memory_space<vmem>>, vector<1x32x256xf32>
    %1 = vector.shape_cast %0 : vector<1x32x256xf32> to vector<32x256xf32>
    %c0_2 = arith.constant 0 : index
    %c0_3 = arith.constant 0 : index
    %2 = vector.load %arg3[%c0_2, %c0_3] : memref<64x32xf32, #tpu.memory_space<vmem>>, vector<64x32xf32>
    %c0_4 = arith.constant 0 : index
    %c0_5 = arith.constant 0 : index
    %3 = vector.load %arg5[%c0_4, %c0_5] : memref<64x64xf32, #tpu.memory_space<vmem>>, vector<64x64xf32>
    %cst = arith.constant dense<0.000000e+00> : vector<64x256xf32>
    %4 = tpu.matmul %2, %1, %cst {dimension_numbers = #tpu.dot_dimension_numbers<[1], [0], [0], [1], [0, 0, 1, 1], [], []>} : vector<64x32xf32>, vector<32x256xf32>, vector<64x256xf32> -> vector<64x256xf32>
    %c0_6 = arith.constant 0 : index
    %c0_7 = arith.constant 0 : index
    %5 = vector.load %arg4[%c0_6, %c0_7] : memref<64x1xf32, #tpu.memory_space<vmem>>, vector<64x1xf32>
    %6 = vector.broadcast %5 : vector<64x1xf32> to vector<64x256xf32>
    %7 = arith.addf %4, %6 : vector<64x256xf32>
    %cst_8 = arith.constant dense<0.000000e+00> : vector<64x256xf32>
    %8 = tpu.matmul %3, %7, %cst_8 {dimension_numbers = #tpu.dot_dimension_numbers<[1], [0], [0], [1], [0, 0, 1, 1], [], []>} : vector<64x64xf32>, vector<64x256xf32>, vector<64x256xf32> -> vector<64x256xf32>
    %c0_9 = arith.constant 0 : index
    %c0_10 = arith.constant 0 : index
    %9 = vector.load %arg6[%c0_9, %c0_10] : memref<64x1xf32, #tpu.memory_space<vmem>>, vector<64x1xf32>
    %10 = vector.broadcast %9 : vector<64x1xf32> to vector<64x256xf32>
    %11 = arith.addf %8, %10 : vector<64x256xf32>
    %12 = arith.addf %11, %7 : vector<64x256xf32>
    %c0_11 = arith.constant 0 : index
    %c0_12 = arith.constant 0 : index
    %13 = vector.load %arg7[%c0_11, %c0_12] : memref<64x1xf32, #tpu.memory_space<vmem>>, vector<64x1xf32>
    %14 = vector.broadcast %13 : vector<64x1xf32> to vector<64x256xf32>
    %15 = arith.mulf %12, %14 : vector<64x256xf32>
    %c0_13 = arith.constant 0 : index
    %c0_14 = arith.constant 0 : index
    %16 = vector.load %arg8[%c0_13, %c0_14] : memref<64x1xf32, #tpu.memory_space<vmem>>, vector<64x1xf32>
    %17 = vector.broadcast %16 : vector<64x1xf32> to vector<64x256xf32>
    %18 = arith.addf %15, %17 : vector<64x256xf32>
    %cst_15 = arith.constant 0.000000e+00 : f32
    %19 = vector.broadcast %cst_15 : f32 to vector<64x256xf32>
    %20 = arith.maximumf %18, %19 : vector<64x256xf32>
    %c0_16 = arith.constant 0 : index
    %c0_17 = arith.constant 0 : index
    %c0_18 = arith.constant 0 : index
    %21 = vector.load %arg9[%c0_16, %c0_17, %c0_18] : memref<1x64x256xf32, #tpu.memory_space<vmem>>, vector<1x64x256xf32>
    %22 = vector.shape_cast %21 : vector<1x64x256xf32> to vector<64x256xf32>
    %23 = vector.shape_cast %20 : vector<64x256xf32> to vector<1x64x256xf32>
    tpu.vector_store %arg9[%c0_16, %c0_17, %c0_18], %23 {strides = array<i32>} : memref<1x64x256xf32, #tpu.memory_space<vmem>>, vector<1x64x256xf32>,
    return
  }
  func.func @transform_0(%arg0: i32, %arg1: i32) -> (i32, i32, i32) {
    %c0_i32 = arith.constant 0 : i32
    %c0_i32_0 = arith.constant 0 : i32
    return %arg0, %c0_i32, %arg1 : i32, i32, i32
  }
  func.func @transform_1(%arg0: i32, %arg1: i32) -> (i32, i32) {
    %c0_i32 = arith.constant 0 : i32
    %c0_i32_0 = arith.constant 0 : i32
    %c0_i32_1 = arith.constant 0 : i32
    return %c0_i32, %c0_i32_0 : i32, i32
  }
  func.func @transform_2(%arg0: i32, %arg1: i32) -> (i32, i32) {
    %c0_i32 = arith.constant 0 : i32
    %c0_i32_0 = arith.constant 0 : i32
    %c0_i32_1 = arith.constant 0 : i32
    return %c0_i32, %c0_i32_0 : i32, i32
  }
  func.func @transform_3(%arg0: i32, %arg1: i32) -> (i32, i32) {
    %c0_i32 = arith.constant 0 : i32
    %c0_i32_0 = arith.constant 0 : i32
    %c0_i32_1 = arith.constant 0 : i32
    return %c0_i32, %c0_i32_0 : i32, i32
  }
  func.func @transform_4(%arg0: i32, %arg1: i32) -> (i32, i32) {
    %c0_i32 = arith.constant 0 : i32
    %c0_i32_0 = arith.constant 0 : i32
    %c0_i32_1 = arith.constant 0 : i32
    return %c0_i32, %c0_i32_0 : i32, i32
  }
  func.func @transform_5(%arg0: i32, %arg1: i32) -> (i32, i32) {
    %c0_i32 = arith.constant 0 : i32
    %c0_i32_0 = arith.constant 0 : i32
    %c0_i32_1 = arith.constant 0 : i32
    return %c0_i32, %c0_i32_0 : i32, i32
  }
  func.func @transform_6(%arg0: i32, %arg1: i32) -> (i32, i32) {
    %c0_i32 = arith.constant 0 : i32
    %c0_i32_0 = arith.constant 0 : i32
    %c0_i32_1 = arith.constant 0 : i32
    return %c0_i32, %c0_i32_0 : i32, i32
  }
  func.func @transform_7(%arg0: i32, %arg1: i32) -> (i32, i32, i32) {
    %c0_i32 = arith.constant 0 : i32
    %c0_i32_0 = arith.constant 0 : i32
    return %arg0, %c0_i32, %arg1 : i32, i32, i32
  }
}

</mosaic_0001>

<bundles_post_ra>
// kernel: tpu_custom_call.1
= control target key start
LH: loop header
LB: loop body
LE: loop exit
PB: predicated region body
PF: predicated region fallthrough
CT: control target
= control target key end

     0   :  { %12 = vsyncpa [#allocation3], 0  ;;  %s1634_s0 = inlined_call_operand.vmem [shape: f32[2,32,256], index: 0, kind: input, shape index: {}]   ;;  %s1635_s1 = inlined_call_operand.vmem [shape: f32[64,32], index: 1, kind: input, shape index: {}]   ;;  %s1636_s2 = inlined_call_operand.vmem [shape: f32[64,1], index: 2, kind: input, shape index: {}]   ;;  %s1637_s3 = inlined_call_operand.vmem [shape: f32[64,64], index: 3, kind: input, shape index: {}]   ;;  %s1638_s4 = inlined_call_operand.vmem [shape: f32[64,1], index: 4, kind: input, shape index: {}]   ;;  %s1639_s5 = inlined_call_operand.vmem [shape: f32[64,1], index: 5, kind: input, shape index: {}]   ;;  %s1640_s6 = inlined_call_operand.vmem [shape: f32[64,1], index: 6, kind: input, shape index: {}]   ;;  %s1641_s7 = inlined_call_operand.hbm [shape: f32[2,64,256], index: 7, kind: output, shape index: {}]  }
   0x1   :  { %14 = vsyncpa [#allocation3 + $0x1], 0  ;;  %s1224_s24 = smov 0   ;;  %s1226_s25 = smov 0  }
   0x2   :  { %s1228_s26 = smov 0   ;;  %s1230_s27 = smov 0  }
   0x3   :  { %s1232_s28 = smov 0   ;;  %s1234_s29 = smov 0  }
   0x4 LB: > { %s975_s30 = sadd.s32 4294967295, %s1177_s29   ;;  %s976_s8 = sadd.s32 4294967294, %s1177_s29   ;;  %s1177_s29 = sphi %s1234_s29, %s20_s29   ;;  %s1173_s28 = sphi %s1232_s28, %s1648_s28   ;;  %s1169_s27 = sphi %s1230_s27, %s1647_s27   ;;  %s1165_s26 = sphi %s1228_s26, %s1646_s26   ;;  %s1161_s25 = sphi %s1226_s25, %s1645_s25   ;;  %s1157_s24 = sphi %s1224_s24, %s1644_s24  }
   0x5   : > { %s32_s9 = sadd.s32 1, %s1173_s28  ;;  %s195_s10 = sadd.s32 1, %s1165_s26 }
   0x6   : > { %p34_p0 = scmp.ge.s32.totalorder %s32_s9, 2  ;;  %p205_p1 = scmp.ne.s32.totalorder %s1165_s26, %s1161_s25 }
   0x7   : > { %p206_p2 = scmp.eq.s32.totalorder %s975_s30, 1  ;;  %p211_p3 = scmp.ne.s32.totalorder %s1161_s25, %s1157_s24 }
   0x8   : > { %s1650_s9 = smov (%p34_p0, %s32_s9), 0  ;;  %p212_p5 = scmp.eq.s32.totalorder %s976_s8, 1 }
   0x9   : > { %p1264_p4 = por %p206_p2, %p205_p1  ;;  %s190_s12 = ssub.s32 %s1173_s28, %s1650_s9 }
   0xa   : > { %p979_p6 = scmp.ge.s32.totalorder %s1177_s29, 1  ;;  %p193_p7 = scmp.eq.s32.totalorder %s190_s12, 0 }
   0xb   : > { %p1271_p8 = por %p212_p5, %p211_p3  ;;  %p261_p9 = scmp.lt.s32.totalorder %s1177_s29, 3 }
   0xc   : > { %s1277_s14 = scalar_select %p193_p7, %s1165_s26, %s195_s10  }
   0xd   : > { %p262_p10 = pnand %p979_p6, %p261_p9 }
   0xe   : > { %p298_p11 = scmp.lt.s32.totalorder (!%p262_p10), %s1169_s27, 1  ;;  %v1179_v0 = vmov (!%p262_p10), 0.0   ;;  %v1180_v1 = vmov (!%p262_p10), 0   ;;  %v332_v2 = vld [vmem:[%s1636_s2] sm:$0xff] (!%p262_p10)  ;;  %v334_v3 = vld [vmem:[%s1636_s2 + $0x10] sm:$0xff] (!%p262_p10)  ;;  %v333_v4 = vld [vmem:[%s1636_s2 + $0x8] sm:$0xff] (!%p262_p10) }
   0xf   : > { %265 = sbr.rel (%p262_p10) target bundleno = 548 (0x224), region = 48  ;;  %469 = vmatprep.mubr.f32.mxu0 (!%p262_p10), %v1179_v0  ;;  %661 = vmatprep.mubr.f32.mxu1 (!%p262_p10), %v1179_v0  ;;  %v335_v5 = vld [vmem:[%s1636_s2 + $0x18] sm:$0xff] (!%p262_p10)  ;;  %v336_v17 = vld [vmem:[%s1636_s2 + $0x20] sm:$0xff] (!%p262_p10)  ;;  %v337_v18 = vld [vmem:[%s1636_s2 + $0x28] sm:$0xff] (!%p262_p10)  ;;  %vm380_vm0 = vcmask (!%p262_p10), 261120   ;;  %vm566_vm1 = vcmask (!%p262_p10), 523264  }
  0x10   : > { %1097 = vset.pattern.permute.xlu0 (!%p262_p10), %v1180_v1  ;;  %1098 = vset.pattern.permute.xlu1 (!%p262_p10), %v1180_v1  ;;  %v338_v20 = vld [vmem:[%s1636_s2 + $0x30] sm:$0xff] (!%p262_p10)  ;;  %v339_v21 = vld [vmem:[%s1636_s2 + $0x38] sm:$0xff] (!%p262_p10)  ;;  %v316_v22 = vld [vmem:[%s1635_s1] sm:$0xff] (!%p262_p10)  ;;  %s1181_s21 = smov (!%p262_p10), [#allocation2]  }
  0x11   : > { %342 = vperm.xlu0 (!%p262_p10), %1097, %v332_v2   ;;  %352 = vperm.xlu1 (!%p262_p10), %1098, %v334_v3   ;;  %v518_v23 = vld [vmem:[%s1638_s4] sm:$0xff] (!%p262_p10)  ;;  %v519_v24 = vld [vmem:[%s1638_s4 + $0x8] sm:$0xff] (!%p262_p10)  ;;  %v520_v26 = vld [vmem:[%s1638_s4 + $0x10] sm:$0xff] (!%p262_p10)  ;;  %s1103_s22 = sshll.u32 (!%p262_p10), %s1181_s21, 4  ;;  %s1104_s22 = int_to_ptr.vmem [resolvable:$false] %s1103_s22 }
  0x12   : > { %v317_v25 = vld [vmem:[%s1635_s1 + $0x8] sm:$0xff] (!%p262_p10)  ;;  %v521_v27 = vld [vmem:[%s1638_s4 + $0x18] sm:$0xff] (!%p262_p10)  ;;  %v318_v28 = vld [vmem:[%s1635_s1 + $0x10] sm:$0xff] (!%p262_p10)  ;;  %s1105_s23 = scalar_lea.vmem (!%p262_p10), %s1104_s22, 4096 }
  0x13   : > { %v522_v29 = vld [vmem:[%s1638_s4 + $0x20] sm:$0xff] (!%p262_p10)  ;;  %v523_v30 = vld [vmem:[%s1638_s4 + $0x28] sm:$0xff] (!%p262_p10)  ;;  %v319_v31 = vld [vmem:[%s1635_s1 + $0x18] sm:$0xff] (!%p262_p10) }
  0x14   : > { %v524_v32 = vld [vmem:[%s1638_s4 + $0x30] sm:$0xff] (!%p262_p10)  ;;  %v525_v33 = vld [vmem:[%s1638_s4 + $0x38] sm:$0xff] (!%p262_p10)  ;;  %v320_v34 = vld [vmem:[%s1635_s1 + $0x20] sm:$0xff] (!%p262_p10) }
  0x15   : > { %347 = vperm.xlu0 (!%p262_p10), %1097, %v333_v4   ;;  %357 = vperm.xlu1 (!%p262_p10), %1098, %v335_v5   ;;  %v720_v35 = vld [vmem:[%s1639_s5] sm:$0xff] (!%p262_p10)  ;;  %v721_v36 = vld [vmem:[%s1639_s5 + $0x8] sm:$0xff] (!%p262_p10)  ;;  %v722_v38 = vld [vmem:[%s1639_s5 + $0x10] sm:$0xff] (!%p262_p10) }
  0x16   : > { %s299_s15 = scalar_select %p298_p11, %s1169_s27, 1  ;;  %v321_v37 = vld [vmem:[%s1635_s1 + $0x28] sm:$0xff]  ;;  %v723_v39 = vld [vmem:[%s1639_s5 + $0x18] sm:$0xff]  ;;  %v322_v40 = vld [vmem:[%s1635_s1 + $0x30] sm:$0xff] }
  0x17   : > { %v724_v41 = vld [vmem:[%s1639_s5 + $0x20] sm:$0xff]  ;;  %v725_v42 = vld [vmem:[%s1639_s5 + $0x28] sm:$0xff]  ;;  %v323_v43 = vld [vmem:[%s1635_s1 + $0x38] sm:$0xff] }
  0x18   : > { %s1004_s20 = sshll.u32 %s299_s15, 6  ;;  %v726_v44 = vld [vmem:[%s1639_s5 + $0x30] sm:$0xff]  ;;  %v727_v45 = vld [vmem:[%s1639_s5 + $0x38] sm:$0xff]  ;;  %v784_v46 = vld [vmem:[%s1640_s6] sm:$0xff]  ;;  %s1005_s15 = sshll.u32 %s1169_s27, 11 }
  0x19   : > { %s305_s8 = scalar_lea.vmem %s1634_s0, %s1004_s20  ;;  %362 = vperm.xlu0 %1097, %v336_v17   ;;  %367 = vperm.xlu1 %1098, %v337_v18   ;;  %v785_v47 = vld [vmem:[%s1640_s6 + $0x8] sm:$0xff]  ;;  %v786_v48 = vld [vmem:[%s1640_s6 + $0x10] sm:$0xff]  ;;  %v787_v49 = vld [vmem:[%s1640_s6 + $0x18] sm:$0xff]  ;;  %s1580_s19 = scalar_lea.hbm %s1641_s7, %s1005_s15 }
  0x1a   : > { %v309_v6 = vld [vmem:[%s305_s8 + $0x8] sm:$0xff]  ;;  %v311_v7 = vld [vmem:[%s305_s8 + $0x18] sm:$0xff]  ;;  %v308_v8 = vld [vmem:[%s305_s8] sm:$0xff] }
  0x1b   : > { %v1006_v9 = vpack.c.bf16 %v311_v7, %v309_v6  ;;  %v310_v10 = vld [vmem:[%s305_s8 + $0x10] sm:$0xff]  ;;  %v313_v11 = vld [vmem:[%s305_s8 + $0x28] sm:$0xff]  ;;  %v315_v12 = vld [vmem:[%s305_s8 + $0x38] sm:$0xff] }
  0x1c   : > { %v1008_v13 = vpack.c.bf16 %v310_v10, %v308_v8  ;;  %v1010_v14 = vpack.c.bf16 %v315_v12, %v313_v11  ;;  %v312_v15 = vld [vmem:[%s305_s8 + $0x20] sm:$0xff]  ;;  %v314_v16 = vld [vmem:[%s305_s8 + $0x30] sm:$0xff]  ;;  %v789_v51 = vld [vmem:[%s1640_s6 + $0x28] sm:$0xff]  ;;  %s294_s8 = sand.u32 1, %s1161_s25  }
  0x1d   : > { %1007 = vmatprep.subr.bf16.mxu0 %v1006_v9  ;;  %v1012_v19 = vpack.c.bf16 %v314_v16, %v312_v15  ;;  %372 = vperm.xlu0 %1097, %v338_v20   ;;  %v788_v50 = vld [vmem:[%s1640_s6 + $0x20] sm:$0xff]  ;;  %v790_v52 = vld [vmem:[%s1640_s6 + $0x30] sm:$0xff]  ;;  %v791_v53 = vld [vmem:[%s1640_s6 + $0x38] sm:$0xff]  ;;  %s980_s10 = sshll.u32 %s294_s8, 7  ;;  %s1588_s27 = scalar_lea.sflag [#allocation3], %s294_s8 }
  0x1e   : > { %1009 = vmatpush1.bf16.msra.mxu0 %v1008_v13  ;;  %377 = vperm.xlu1 %1098, %v339_v21   ;;  %s1533_s12 = scalar_lea.vmem [#allocation2], %s980_s10 }
  0x1f   : > { %1011 = vmatprep.subr.bf16.mxu0 %v1010_v14  ;;  %s896_s16 = sshll.u32 %s1533_s12, 4  ;;  %s1582_s16 = int_to_ptr.vmem [resolvable:$true] %s896_s16 }
  0x20   : > { %s1099_s20 = scalar_lea.vmem %s1582_s16, 2048  ;;  %p1106_p1 = scmp.lt.s32.totalorder %s1582_s16, %s1104_s22 }
  0x21   : > { %528 = vperm.xlu0 %1097, %v518_v23   ;;  %p1100_p12 = scmp.ne.s32.totalorder %s1582_s16, %s1099_s20  ;;  %p1107_p2 = scmp.lt.s32.totalorder %s1105_s23, %s1099_s20 }
  0x22   : > { %1013 = vmatpush1.bf16.msra.mxu0 %v1012_v19  ;;  %533 = vperm.xlu1 %1098, %v519_v24  }
  0x23   : > { %p1101_p13 = pnand %p1100_p12, %p1264_p4  ;;  %p1108_p3 = por %p1107_p2, %p1106_p1 }
  0x25   : > { %983 = vmatmul.mubr.msk.f32.vlgmr.msra.gmra.mrb[0].mxu0 %vm380_vm0, %v316_v22  ;;  %538 = vperm.xlu0 %1097, %v520_v26   ;;  %p1102_p0 = pneg %p1101_p13 }
  0x26   : > { %475 = vmatprep.mubr.f32.mxu0 %v1179_v0  ;;  %543 = vperm.xlu1 %1098, %v521_v27  }
  0x27   : > { %p1109_p5 = pnand %p1108_p3, %p1102_p0 }
  0x29   : > { %984 = vmatmul.mubr.msk.f32.gmra.mrb[2].mxu0 %vm380_vm0, %v317_v25  ;;  %548 = vperm.xlu0 %1097, %v522_v29  }
  0x2a   : > { %481 = vmatprep.mubr.f32.mxu0 %v1179_v0  ;;  %553 = vperm.xlu1 %1098, %v523_v30  }
  0x2d   : > { %985 = vmatmul.mubr.msk.f32.gmra.mrb[4].mxu0 %vm380_vm0, %v318_v28  ;;  %558 = vperm.xlu0 %1097, %v524_v32  }
  0x2e   : > { %487 = vmatprep.mubr.f32.mxu0 %v1179_v0  ;;  %563 = vperm.xlu1 %1098, %v525_v33  }
  0x31   : > { %986 = vmatmul.mubr.msk.f32.gmra.mrb[6].mxu0 %vm380_vm0, %v319_v31  ;;  %730 = vperm.xlu0 %1097, %v720_v35  }
  0x32   : > { %493 = vmatprep.mubr.f32.mxu0 %v1179_v0  ;;  %735 = vperm.xlu1 %1098, %v721_v36  }
  0x35   : > { %987 = vmatmul.mubr.msk.f32.gmra.mrb[8].mxu0 %vm380_vm0, %v320_v34  ;;  %740 = vperm.xlu0 %1097, %v722_v38  }
  0x36   : > { %499 = vmatprep.mubr.f32.mxu0 %v1179_v0  ;;  %745 = vperm.xlu1 %1098, %v723_v39   ;;  %v324_v39 = vld [vmem:[%s1637_s3] sm:$0xff] }
  0x39   : > { %988 = vmatmul.mubr.msk.f32.gmra.mrb[10].mxu0 %vm380_vm0, %v321_v37  ;;  %750 = vperm.xlu0 %1097, %v724_v41   ;;  %v326_v41 = vld [vmem:[%s1637_s3 + $0x10] sm:$0xff] }
  0x3a   : > { %505 = vmatprep.mubr.f32.mxu0 %v1179_v0  ;;  %755 = vperm.xlu1 %1098, %v725_v42   ;;  %v327_v42 = vld [vmem:[%s1637_s3 + $0x18] sm:$0xff] }
  0x3d   : > { %989 = vmatmul.mubr.msk.f32.gmra.mrb[12].mxu0 %vm380_vm0, %v322_v40  ;;  %760 = vperm.xlu0 %1097, %v726_v44   ;;  %v325_v40 = vld [vmem:[%s1637_s3 + $0x8] sm:$0xff] }
  0x3e   : > { %511 = vmatprep.mubr.f32.mxu0 %v1179_v0  ;;  %765 = vperm.xlu1 %1098, %v727_v45   ;;  %v329_v44 = vld [vmem:[%s1637_s3 + $0x28] sm:$0xff]  ;;  %v330_v45 = vld [vmem:[%s1637_s3 + $0x30] sm:$0xff] }
  0x41   : > { %990 = vmatmul.mubr.msk.f32.gmra.mrb[14].mxu0 %vm380_vm0, %v323_v43  ;;  %794 = vperm.xlu0 %1097, %v784_v46   ;;  %v328_v43 = vld [vmem:[%s1637_s3 + $0x20] sm:$0xff]  ;;  %v331_v46 = vld [vmem:[%s1637_s3 + $0x38] sm:$0xff] }
  0x42   : > { %655 = vmatprep.mubr.f32.mxu0 %v1179_v0  ;;  %799 = vperm.xlu1 %1098, %v785_v47  }
  0x45   : > { %804 = vperm.xlu0 %1097, %v786_v48  }
  0x46   : > { %809 = vperm.xlu1 %1098, %v787_v49  }
  0x49   : > { %814 = vperm.xlu0 %1097, %v788_v50  }
  0x4a   : > { %819 = vperm.xlu1 %1098, %v789_v51  }
  0x4d   : > { %824 = vperm.xlu0 %1097, %v790_v52  }
  0x4e   : > { %829 = vperm.xlu1 %1098, %v791_v53  }
  0x90   : > { %v343_v54 = vpop.permute.xlu0 %342  ;;  %v353_v61 = vpop.permute.xlu1 %352 }
  0x94   : > { %v348_v57 = vpop.permute.xlu0 %347  ;;  %v358_v6 = vpop.permute.xlu1 %357 }
  0x98   : > { %v368_v17 = vpop.permute.xlu1 %367  ;;  %v363_v19 = vpop.permute.xlu0 %362 }
  0x9c   : > { %v373_v31 = vpop.permute.xlu0 %372 }
  0x9d   : > { %v378_v29 = vpop.permute.xlu1 %377 }
  0xa0   : > { %v529_v47 = vpop.permute.xlu0 %528 }
  0xa1   : > { %v534_v48 = vpop.permute.xlu1 %533 }
  0xa4   : > { %v539_v49 = vpop.permute.xlu0 %538 }
  0xa5   : > { %v544_v50 = vpop.permute.xlu1 %543 }
  0xa8   : > { %v1508_v51 = vpop.permute.xlu0 %548 }
  0xa9   : > { %v1510_v52 = vpop.permute.xlu1 %553 }
  0xac   : > { %v1512_v53 = vpop.permute.xlu0 %558 }
  0xf8   : > { %v471_v55 = vpop.f32.mrb[0].mxu0 }
  0xf9   : > { %v473_v56 = vpop.f32.mrb[1].mxu0  ;;  %v1428_v1 = vadd.f32 %v471_v55, %v343_v54 }
  0xfa   : > { %v1424_v62 = vadd.f32 %v473_v56, %v343_v54  ;;  %v1514_v54 = vpop.permute.xlu1 %563 }
  0xfc   : > { %v477_v58 = vpop.f32.mrb[2].mxu0 }
  0xfd   : > { %v1422_v59 = vadd.f32 %v477_v58, %v348_v57  ;;  %v479_v60 = vpop.f32.mrb[3].mxu0 }
  0xfe   : > { %v1426_v63 = vadd.f32 %v479_v60, %v348_v57  ;;  %v736_v55 = vpop.permute.xlu1 %735 }
  0xff   : > { %v1016_v4 = vpack.c.bf16 %v1422_v59, %v1428_v1 }
 0x100   : > { %v1014_v2 = vpack.c.bf16 %v1426_v63, %v1424_v62  ;;  %v483_v3 = vpop.f32.mrb[4].mxu0 }
 0x101   : > { %v485_v5 = vpop.f32.mrb[5].mxu0  ;;  %v1440_v12 = vadd.f32 %v483_v3, %v353_v61 }
 0x102   : > { %1015 = vmatprep.subr.bf16.mxu0 %v1014_v2  ;;  %1030 = vmatprep.subr.bf16.mxu1 %v1014_v2  ;;  %v1436_v10 = vadd.f32 %v485_v5, %v353_v61  ;;  %v746_v57 = vpop.permute.xlu1 %745 }
 0x103   : > { %1017 = vmatpush1.bf16.msra.mxu0 %v1016_v4  ;;  %1034 = vmatpush1.bf16.msra.mxu1 %v1016_v4 }
 0x104   : > { %v489_v7 = vpop.f32.mrb[6].mxu0 }
 0x105   : > { %v1434_v8 = vadd.f32 %v489_v7, %v358_v6  ;;  %v491_v9 = vpop.f32.mrb[7].mxu0 }
 0x106   : > { %v1438_v11 = vadd.f32 %v491_v9, %v358_v6  ;;  %v1518_v60 = vpop.permute.xlu1 %755 }
 0x107   : > { %v1020_v15 = vpack.c.bf16 %v1434_v8, %v1440_v12 }
 0x108   : > { %v1018_v13 = vpack.c.bf16 %v1438_v11, %v1436_v10  ;;  %v495_v14 = vpop.f32.mrb[8].mxu0 }
 0x109   : > { %v497_v16 = vpop.f32.mrb[9].mxu0  ;;  %v1452_v24 = vadd.f32 %v495_v14, %v363_v19 }
 0x10a   : > { %1019 = vmatprep.subr.bf16.mxu0 %v1018_v13  ;;  %1031 = vmatprep.subr.bf16.mxu1 %v1018_v13  ;;  %v1448_v22 = vadd.f32 %v497_v16, %v363_v19  ;;  %v1522_v2 = vpop.permute.xlu1 %765 }
 0x10b   : > { %1021 = vmatpush1.bf16.msra.mxu0 %v1020_v15  ;;  %1035 = vmatpush1.bf16.msra.mxu1 %v1020_v15 }
 0x10c   : > { %v501_v18 = vpop.f32.mrb[10].mxu0 }
 0x10d   : > { %v1446_v20 = vadd.f32 %v501_v18, %v368_v17  ;;  %v503_v21 = vpop.f32.mrb[11].mxu0 }
 0x10e   : > { %v1450_v23 = vadd.f32 %v503_v21, %v368_v17 }
 0x10f   : > { %v1024_v27 = vpack.c.bf16 %v1446_v20, %v1452_v24 }
 0x110   : > { %v1022_v25 = vpack.c.bf16 %v1450_v23, %v1448_v22  ;;  %v507_v26 = vpop.f32.mrb[12].mxu0 }
 0x111   : > { %v509_v28 = vpop.f32.mrb[13].mxu0  ;;  %v1464_v36 = vadd.f32 %v507_v26, %v373_v31 }
 0x112   : > { %1023 = vmatprep.subr.bf16.mxu0 %v1022_v25  ;;  %1032 = vmatprep.subr.bf16.mxu1 %v1022_v25  ;;  %v1460_v34 = vadd.f32 %v509_v28, %v373_v31 }
 0x113   : > { %1025 = vmatpush1.bf16.msra.mxu0 %v1024_v27  ;;  %1036 = vmatpush1.bf16.msra.mxu1 %v1024_v27 }
 0x114   : > { %v513_v30 = vpop.f32.mrb[14].mxu0 }
 0x115   : > { %v1458_v32 = vadd.f32 %v513_v30, %v378_v29  ;;  %v515_v33 = vpop.f32.mrb[15].mxu0 }
 0x116   : > { %v1462_v35 = vadd.f32 %v515_v33, %v378_v29  ;;  %v800_v29 = vpop.permute.xlu1 %799 }
 0x117   : > { %v1028_v38 = vpack.c.bf16 %v1458_v32, %v1464_v36 }
 0x118   : > { %v1026_v37 = vpack.c.bf16 %v1462_v35, %v1460_v34 }
 0x11a   : > { %1027 = vmatprep.subr.bf16.mxu0 %v1026_v37  ;;  %1033 = vmatprep.subr.bf16.mxu1 %v1026_v37 }
 0x11b   : > { %1029 = vmatpush1.bf16.msra.mxu0 %v1028_v38  ;;  %1037 = vmatpush1.bf16.msra.mxu1 %v1028_v38 }
 0x11e   : > { %991 = vmatmul.mubr.msk.f32.vlgmr.msra.gmra.mrb[16].mxu0 %vm566_vm1, %v324_v39  ;;  %992 = vmatmul.mubr.msk.f32.vlgmr.msra.gmra.mrb[0].mxu1 %vm566_vm1, %v325_v40 }
 0x11f   : > { %667 = vmatprep.mubr.f32.mxu1 %v1179_v0 }
 0x122   : > { %993 = vmatmul.mubr.msk.f32.gmra.mrb[2].mxu1 %vm566_vm1, %v326_v41 }
 0x123   : > { %673 = vmatprep.mubr.f32.mxu1 %v1179_v0 }
 0x126   : > { %994 = vmatmul.mubr.msk.f32.gmra.mrb[4].mxu1 %vm566_vm1, %v327_v42 }
 0x127   : > { %679 = vmatprep.mubr.f32.mxu1 %v1179_v0 }
 0x12a   : > { %995 = vmatmul.mubr.msk.f32.gmra.mrb[6].mxu1 %vm566_vm1, %v328_v43 }
 0x12b   : > { %685 = vmatprep.mubr.f32.mxu1 %v1179_v0 }
 0x12e   : > { %996 = vmatmul.mubr.msk.f32.gmra.mrb[8].mxu1 %vm566_vm1, %v329_v44 }
 0x12f   : > { %691 = vmatprep.mubr.f32.mxu1 %v1179_v0 }
 0x132   : > { %997 = vmatmul.mubr.msk.f32.gmra.mrb[10].mxu1 %vm566_vm1, %v330_v45 }
 0x133   : > { %697 = vmatprep.mubr.f32.mxu1 %v1179_v0  ;;  %v731_v0 = vpop.permute.xlu0 %730 }
 0x136   : > { %998 = vmatmul.mubr.msk.f32.gmra.mrb[12].mxu1 %vm566_vm1, %v331_v46 }
 0x137   : > { %v741_v56 = vpop.permute.xlu0 %740 }
 0x13b   : > { %v1516_v58 = vpop.permute.xlu0 %750 }
 0x13f   : > { %v1520_v61 = vpop.permute.xlu0 %760 }
 0x143   : > { %v795_v17 = vpop.permute.xlu0 %794 }
 0x147   : > { %v805_v45 = vpop.permute.xlu0 %804 }
 0x1f1   : > { %v657_v3 = vpop.f32.mrb[16].mxu0  ;;  %v663_v4 = vpop.f32.mrb[0].mxu1 }
 0x1f2   : > { %v658_v5 = vadd.f32 %v657_v3, %v529_v47  ;;  %v664_v6 = vadd.f32 %v663_v4, %v534_v48  ;;  %v659_v7 = vpop.f32.mrb[17].mxu0  ;;  %v665_v9 = vpop.f32.mrb[1].mxu1 }
 0x1f3   : > { %v660_v13 = vadd.f32 %v659_v7, %v529_v47  ;;  %v666_v14 = vadd.f32 %v665_v9, %v534_v48 }
 0x1f4   : > { %v704_v15 = vadd.f32 %v658_v5, %v1428_v1  ;;  %v706_v16 = vadd.f32 %v664_v6, %v1422_v59  ;;  %v810_v6 = vpop.permute.xlu1 %809 }
 0x1f5   : > { %v705_v18 = vadd.f32 %v660_v13, %v1424_v62  ;;  %v707_v19 = vadd.f32 %v666_v14, %v1426_v63  ;;  %v669_v21 = vpop.f32.mrb[2].mxu1 }
 0x1f6   : > { %v768_v25 = vmul.f32 %v731_v0, %v704_v15  ;;  %v770_v26 = vmul.f32 %v736_v55, %v706_v16  ;;  %v670_v27 = vadd.f32 %v669_v21, %v539_v49  ;;  %v671_v28 = vpop.f32.mrb[3].mxu1 }
 0x1f7   : > { %v769_v30 = vmul.f32 %v731_v0, %v705_v18  ;;  %v771_v31 = vmul.f32 %v736_v55, %v707_v19  ;;  %v672_v33 = vadd.f32 %v671_v28, %v539_v49 }
 0x1f8   : > { %v832_v37 = vadd.f32 %v795_v17, %v768_v25  ;;  %v834_v1 = vadd.f32 %v800_v29, %v770_v26  ;;  %v708_v59 = vadd.f32 %v670_v27, %v1440_v12 }
 0x1f9   : > { %v833_v38 = vadd.f32 %v795_v17, %v769_v30  ;;  %v835_v39 = vadd.f32 %v800_v29, %v771_v31  ;;  %v709_v62 = vadd.f32 %v672_v33, %v1436_v10  ;;  %v675_v63 = vpop.f32.mrb[4].mxu1 }
 0x1fa   : > { %v848_v40 = vmax.f32 %v832_v37, 0.0  ;;  %v850_v41 = vmax.f32 %v834_v1, 0.0  ;;  %v772_v42 = vmul.f32 %v741_v56, %v708_v59  ;;  %v676_v43 = vadd.f32 %v675_v63, %v544_v50  ;;  %v677_v44 = vpop.f32.mrb[5].mxu1 }
 0x1fb   : > { %v849_v46 = vmax.f32 %v833_v38, 0.0  ;;  %v851_v47 = vmax.f32 %v835_v39, 0.0  ;;  %v773_v48 = vmul.f32 %v741_v56, %v709_v62  ;;  %v678_v0 = vadd.f32 %v677_v44, %v544_v50 }
 0x1fc   : > { %864 = vst [vmem:[%s1533_s12] sm:$0xff] %v848_v40  ;;  %866 = vst [vmem:[%s1533_s12 + $0x10] sm:$0xff] %v850_v41  ;;  %v836_v10 = vadd.f32 %v805_v45, %v772_v42  ;;  %v710_v12 = vadd.f32 %v676_v43, %v1434_v8 }
 0x1fd   : > { %865 = vst [vmem:[%s1533_s12 + $0x8] sm:$0xff] %v849_v46  ;;  %867 = vst [vmem:[%s1533_s12 + $0x18] sm:$0xff] %v851_v47  ;;  %v837_v49 = vadd.f32 %v805_v45, %v773_v48  ;;  %v711_v55 = vadd.f32 %v678_v0, %v1438_v11  ;;  %v681_v56 = vpop.f32.mrb[6].mxu1 }
 0x1fe   : > { %v852_v50 = vmax.f32 %v836_v10, 0.0  ;;  %v774_v3 = vmul.f32 %v746_v57, %v710_v12  ;;  %v682_v4 = vadd.f32 %v681_v56, %v1508_v51  ;;  %v683_v5 = vpop.f32.mrb[7].mxu1 }
 0x1ff   : > { %v853_v7 = vmax.f32 %v837_v49, 0.0  ;;  %v775_v9 = vmul.f32 %v746_v57, %v711_v55  ;;  %v684_v13 = vadd.f32 %v683_v5, %v1508_v51  ;;  %v815_v57 = vpop.permute.xlu0 %814 }
 0x200   : > { %868 = vst [vmem:[%s1533_s12 + $0x20] sm:$0xff] %v852_v50  ;;  %v838_v8 = vadd.f32 %v810_v6, %v774_v3  ;;  %v712_v14 = vadd.f32 %v682_v4, %v1452_v24 }
 0x201   : > { %869 = vst [vmem:[%s1533_s12 + $0x28] sm:$0xff] %v853_v7  ;;  %v839_v15 = vadd.f32 %v810_v6, %v775_v9  ;;  %v713_v11 = vadd.f32 %v684_v13, %v1448_v22  ;;  %v687_v16 = vpop.f32.mrb[8].mxu1 }
 0x202   : > { %v854_v17 = vmax.f32 %v838_v8, 0.0  ;;  %v776_v18 = vmul.f32 %v1516_v58, %v712_v14  ;;  %v688_v19 = vadd.f32 %v687_v16, %v1510_v52  ;;  %v689_v21 = vpop.f32.mrb[9].mxu1 }
 0x203   : > { %v855_v25 = vmax.f32 %v839_v15, 0.0  ;;  %v777_v51 = vmul.f32 %v1516_v58, %v713_v11  ;;  %v690_v26 = vadd.f32 %v689_v21, %v1510_v52  ;;  %v820_v58 = vpop.permute.xlu1 %819 }
 0x204   : > { %870 = vst [vmem:[%s1533_s12 + $0x30] sm:$0xff] %v854_v17  ;;  %v840_v24 = vadd.f32 %v815_v57, %v776_v18  ;;  %v714_v27 = vadd.f32 %v688_v19, %v1446_v20 }
 0x205   : > { %871 = vst [vmem:[%s1533_s12 + $0x38] sm:$0xff] %v855_v25  ;;  %v841_v22 = vadd.f32 %v815_v57, %v777_v51  ;;  %v715_v28 = vadd.f32 %v690_v26, %v1450_v23  ;;  %v693_v29 = vpop.f32.mrb[10].mxu1 }
 0x206   : > { %v856_v30 = vmax.f32 %v840_v24, 0.0  ;;  %v778_v31 = vmul.f32 %v1518_v60, %v714_v27  ;;  %v694_v33 = vadd.f32 %v693_v29, %v1512_v53  ;;  %v695_v37 = vpop.f32.mrb[11].mxu1 }
 0x207   : > { %v857_v1 = vmax.f32 %v841_v22, 0.0  ;;  %v779_v52 = vmul.f32 %v1518_v60, %v715_v28  ;;  %v696_v59 = vadd.f32 %v695_v37, %v1512_v53  ;;  %v825_v60 = vpop.permute.xlu0 %824  ;;  %v830_v0 = vpop.permute.xlu1 %829 }
 0x208   : > { %872 = vst [vmem:[%s1533_s12 + $0x40] sm:$0xff] %v856_v30  ;;  %v842_v20 = vadd.f32 %v820_v58, %v778_v31  ;;  %v716_v38 = vadd.f32 %v694_v33, %v1464_v36 }
 0x209   : > { %873 = vst [vmem:[%s1533_s12 + $0x48] sm:$0xff] %v857_v1  ;;  %v843_v23 = vadd.f32 %v820_v58, %v779_v52  ;;  %v717_v39 = vadd.f32 %v696_v59, %v1460_v34  ;;  %v699_v62 = vpop.f32.mrb[12].mxu1 }
 0x20a   : > { %v858_v63 = vmax.f32 %v842_v20, 0.0  ;;  %v780_v40 = vmul.f32 %v1520_v61, %v716_v38  ;;  %v700_v41 = vadd.f32 %v699_v62, %v1514_v54  ;;  %v701_v42 = vpop.f32.mrb[13].mxu1 }
 0x20b   : > { %v859_v53 = vmax.f32 %v843_v23, 0.0  ;;  %v781_v43 = vmul.f32 %v1520_v61, %v717_v39  ;;  %v702_v36 = vadd.f32 %v701_v42, %v1514_v54 }
 0x20c   : > { %874 = vst [vmem:[%s1533_s12 + $0x50] sm:$0xff] %v858_v63  ;;  %v844_v44 = vadd.f32 %v825_v60, %v780_v40  ;;  %v718_v34 = vadd.f32 %v700_v41, %v1458_v32 }
 0x20d   : > { %875 = vst [vmem:[%s1533_s12 + $0x58] sm:$0xff] %v859_v53  ;;  %v845_v45 = vadd.f32 %v825_v60, %v781_v43  ;;  %v719_v46 = vadd.f32 %v702_v36, %v1462_v35 }
 0x20e   : > { %v860_v47 = vmax.f32 %v844_v44, 0.0  ;;  %v782_v48 = vmul.f32 %v1522_v2, %v718_v34 }
 0x20f   : > { %v861_v10 = vmax.f32 %v845_v45, 0.0  ;;  %v783_v61 = vmul.f32 %v1522_v2, %v719_v46 }
 0x210   : > { %876 = vst [vmem:[%s1533_s12 + $0x60] sm:$0xff] %v860_v47  ;;  %v846_v54 = vadd.f32 %v830_v0, %v782_v48 }
 0x211   : > { %877 = vst [vmem:[%s1533_s12 + $0x68] sm:$0xff] %v861_v10  ;;  %v847_v32 = vadd.f32 %v830_v0, %v783_v61 }
 0x212   : > { %v862_v12 = vmax.f32 %v846_v54, 0.0 }
 0x213   : > { %v863_v35 = vmax.f32 %v847_v32, 0.0 }
 0x214   : > { %878 = vst [vmem:[%s1533_s12 + $0x70] sm:$0xff] %v862_v12 }
 0x215   : > { %879 = vst [vmem:[%s1533_s12 + $0x78] sm:$0xff] %v863_v35 }
 0x216   : > { %1112 = shalt.err (!%p1109_p5)
}
 0x217   : > { %s1113_s30 = scalar_lea.hbm %s1580_s19, 2048  ;;  %s1117_s12 = scalar_lea.hbm %s1641_s7, 4096 }
 0x218   : > { %p1114_p6 = scmp.ne.s32.totalorder %s1580_s19, %s1113_s30  ;;  %p1118_p10 = scmp.lt.u32.totalorder %s1580_s19, %s1641_s7 }
 0x219   : > { %p1119_p11 = scmp.lt.u32.totalorder %s1117_s12, %s1113_s30  ;;  %p1121_p13 = scmp.lt.u32.totalorder %s1113_s30, %s1580_s19 }
 0x21a   : > { %p1115_p7 = pnand %p1114_p6, %p1264_p4 }
 0x21b   : > { %p1120_p12 = por %p1119_p11, %p1118_p10 }
 0x21c   : > { %p1116_p9 = pneg %p1115_p7 }
 0x21d   : > { %p1122_p0 = por %p1121_p13, %p1120_p12 }
 0x21f   : > { %p1123_p1 = pnand %p1122_p0, %p1116_p9 }
 0x221   : > { %1126 = shalt.err (!%p1123_p1)
}
 0x222   : > { %s1182_s18 = smov 256   ;;  %s1183_s20 = smov 16  }
 0x223   : > { %1038 = dma.vmem_to_hbm [thread:$0]  (%p1264_p4), %s1582_s16, 2048, %s1580_s19, %s1588_s27, %s1182_s18, %s1182_s18, %s1183_s20  }
 0x224 PF: > { %p1044_p2 = scmp.ge.s32.totalorder %s1177_s29, 2  ;;  %s911_s21 = sand.u32 1, %s1157_s24  }
 0x225   : > { %s912_s22 = scalar_lea.sflag [#allocation3], %s911_s21 }
 0x226   : > { %p1041_p3 = pnand %p1044_p2, %p1271_p8 }
 0x228   : > { %1152 = dma.done.wait (!%p1041_p3), %s912_s22, 2048  }
 0x229   : > { %1154 = vsyncadd (!%p1041_p3), %s912_s22, 4294965248  ;;  %s20_s29 = sadd.s32 1, %s1177_s29   ;;  %s1644_s24 = smov %s1161_s25 }
 0x22a   : > { %p17_p5 = scmp.ge.s32.totalorder %s20_s29, 4   ;;  %s1645_s25 = smov %s1165_s26 }
 0x22b   : > { %s1646_s26 = smov %s1277_s14  ;;  %s1647_s27 = smov %s1173_s28 }
 0x22c   : > { %s1648_s28 = smov %s1650_s9  ;;  %19 = sbr.rel (!%p17_p5) target bundleno = 4 (0x4), region = 83 }
 0x233   :  { %917 = vsyncpa [#allocation3], 1 }
 0x234   :  { %919 = vsyncpa [#allocation3 + $0x1], 1 }

</bundles_post_ra>
